<compile_context>
chip_gen: v5e
topology: v5e:2x2
jax: 0.10.0
libtpu: 0.0.40
codegen_flags: <defaults>
</compile_context>

<pallas_src>
import functools

import jax
import jax.numpy as jnp
from jax.experimental import pallas as pl
from jax.experimental.pallas import tpu as pltpu


def _conv1x1_kernel(w_ref, x_ref, o_ref):
    """w_ref: (Cout, Cin)  effective entangled kernel (grid-invariant, resident)
       x_ref: (Cin, ts)    input tile  (channels x spatial, NCHW layout)
       o_ref: (Cout, ts)   output tile (spatial in lanes -> lane-dense stores)
    """
    o_ref[...] = jnp.dot(
        w_ref[...], x_ref[...], preferred_element_type=jnp.float32
    ).astype(o_ref.dtype)


def _pick_spatial_tile(hw, ts_max=2048):
    """Largest 128-multiple divisor of hw up to ts_max; else the full extent."""
    if hw % 128 == 0:
        for cand in (2048, 1024, 512, 256, 128):
            if cand <= ts_max and hw % cand == 0:
                return cand
    return hw  # full-extent block is always legal


def entangled_mixed_conv1x1(x_nchw, weights, w_shared, cand_in_channels,
                            use_argmax=False, *, ts_max=2048):
    """Weight-entangled mixed 1x1 conv.

    x_nchw:  (N, Cin, H, W)
    weights: (K,) mixture weights over candidates
    w_shared:(Cout, Cin) shared 1x1 conv kernel
    cand_in_channels: list of K ints, candidate k uses first c_k input chans
    """
    N, Cin, H, W = x_nchw.shape
    Cout, Cin_w = w_shared.shape
    assert Cin == Cin_w
    K = len(cand_in_channels)

    # --- tiny wrapper-side algebra (no K-times-duplicated weight stack) ---
    if use_argmax:
        alpha = jax.nn.one_hot(jnp.argmax(weights), K, dtype=jnp.float32)
    else:
        alpha = weights.astype(jnp.float32)
    chan = jnp.arange(Cin)
    cands = jnp.asarray(cand_in_channels)
    # per-input-channel scale: s[c] = sum_k alpha_k * (c < c_k)
    s = jnp.sum(alpha[:, None] * (chan[None, :] < cands[:, None]).astype(jnp.float32),
                axis=0)                                             # (Cin,)
    w_eff = (w_shared.astype(jnp.float32) * s[None, :]).astype(x_nchw.dtype)  # (Cout, Cin)

    # --- NCHW kept: pure reshape, no transpose ---
    HW = H * W
    x_flat = x_nchw.reshape(N, Cin, HW)

    ts = _pick_spatial_tile(HW, ts_max)
    assert HW % ts == 0
    grid = (N, HW // ts)

    out_flat = pl.pallas_call(
        _conv1x1_kernel,
        out_shape=jax.ShapeDtypeStruct((N, Cout, HW), x_nchw.dtype),
        grid_spec=pltpu.PrefetchScalarGridSpec(
            num_scalar_prefetch=0,
            grid=grid,
            in_specs=[
                # effective kernel: resident across the whole grid
                pl.BlockSpec((Cout, Cin), lambda n, j: (0, 0)),
                # input tile: (Cin, ts) per (batch, spatial-tile), batch squeezed
                pl.BlockSpec((None, Cin, ts), lambda n, j: (n, 0, j)),
            ],
            out_specs=pl.BlockSpec((None, Cout, ts), lambda n, j: (n, 0, j)),
        ),
        compiler_params=pltpu.CompilerParams(
            dimension_semantics=("parallel", "parallel")),
    )(w_eff, x_flat)

    return out_flat.reshape(N, Cout, H, W)


class EntangledOp:
    """JAX mirror of the PyTorch EntangledOp wrapper."""

    def __init__(self, op, name):
        self.op = op
        self.name = name

    def forward(self, x, weights, use_argmax=False, **extra_params):
        return self.op(x, weights, use_argmax=use_argmax, **extra_params)

    __call__ = forward

    def wider(self, C1, C2):
        # TODO(synk): network-morphism `wider` mutates op parameters in-place;
        # parameter surgery stays outside the kernel.
        pass


def _reference(x_nchw, weights, w_shared, cand_in_channels, use_argmax):
    Cin = x_nchw.shape[1]
    K = len(cand_in_channels)
    chan = jnp.arange(Cin)
    masks = jnp.stack([(chan < c).astype(jnp.float32) for c in cand_in_channels])
    wstack = masks[:, :, None] * w_shared.T[None, :, :]
    if use_argmax:
        alpha = jax.nn.one_hot(jnp.argmax(weights), K, dtype=jnp.float32)
    else:
        alpha = weights.astype(jnp.float32)
    w_eff = jnp.einsum('k,kio->io', alpha, wstack)               # (Cin, Cout)
    return jnp.einsum('nchw,co->nohw', x_nchw, w_eff)


if __name__ == "__main__":
    key = jax.random.PRNGKey(0)
    kx, kw, ka = jax.random.split(key, 3)

    N, Cin, H, W = 2, 4, 16, 16
    Cout = 8
    cand_in_channels = [2, 3, 4]          # K = 3 entangled candidates
    K = len(cand_in_channels)

    x = jax.random.normal(kx, (N, Cin, H, W), dtype=jnp.float32)
    w_shared = jax.random.normal(kw, (Cout, Cin), dtype=jnp.float32) * 0.1
    weights = jax.nn.softmax(jax.random.normal(ka, (K,), dtype=jnp.float32))

    inner_op = functools.partial(entangled_mixed_conv1x1,
                                 w_shared=w_shared,
                                 cand_in_channels=cand_in_channels)
    module = EntangledOp(inner_op, name="entangled_conv1x1")

    out_mix = module(x, weights, use_argmax=False)
    out_arg = module(x, weights, use_argmax=True)
    jax.block_until_ready((out_mix, out_arg))

    ref_mix = _reference(x, weights, w_shared, cand_in_channels, False)
    ref_arg = _reference(x, weights, w_shared, cand_in_channels, True)
    assert out_mix.shape == (N, Cout, H, W)
    assert jnp.allclose(out_mix, ref_mix, atol=1e-4, rtol=1e-4)
    assert jnp.allclose(out_arg, ref_arg, atol=1e-4, rtol=1e-4)

    print("KERNEL_OK")
</pallas_src>

<mosaic_0001>
module attributes {stable_mosaic.version = 11 : i64} {
  func.func @_conv1x1_kernel(%arg0: i32, %arg1: i32, %arg2: memref<8x4xf32, #tpu.memory_space<vmem>>, %arg3: memref<1x4x256xf32, #tpu.memory_space<vmem>>, %arg4: memref<1x8x256xf32, #tpu.memory_space<vmem>>) attributes {dimension_semantics = [#tpu.dimension_semantics<parallel>, #tpu.dimension_semantics<parallel>], iteration_bounds = array<i64: 2, 1>, scalar_prefetch = 0 : i64, scratch_operands = 0 : i64, tpu.core_type = #tpu.core_type<tc>, window_params = [{pipeline_mode = #tpu.pipeline_mode<synchronous>, transform_indices = @transform_0, window_bounds = array<i64: 8, 4>}, {transform_indices = @transform_1, window_bounds = array<i64: 1, 4, 256>}, {transform_indices = @transform_2, window_bounds = array<i64: 1, 8, 256>}]} {
    %c0 = arith.constant 0 : index
    %c0_0 = arith.constant 0 : index
    %0 = vector.load %arg2[%c0, %c0_0] : memref<8x4xf32, #tpu.memory_space<vmem>>, vector<8x4xf32>
    %c0_1 = arith.constant 0 : index
    %c0_2 = arith.constant 0 : index
    %c0_3 = arith.constant 0 : index
    %1 = vector.load %arg3[%c0_1, %c0_2, %c0_3] : memref<1x4x256xf32, #tpu.memory_space<vmem>>, vector<1x4x256xf32>
    %2 = vector.shape_cast %1 : vector<1x4x256xf32> to vector<4x256xf32>
    %cst = arith.constant dense<0.000000e+00> : vector<8x256xf32>
    %3 = tpu.matmul %0, %2, %cst {dimension_numbers = #tpu.dot_dimension_numbers<[1], [0], [0], [1], [0, 0, 1, 1], [], []>} : vector<8x4xf32>, vector<4x256xf32>, vector<8x256xf32> -> vector<8x256xf32>
    %c0_4 = arith.constant 0 : index
    %c0_5 = arith.constant 0 : index
    %c0_6 = arith.constant 0 : index
    %4 = vector.load %arg4[%c0_4, %c0_5, %c0_6] : memref<1x8x256xf32, #tpu.memory_space<vmem>>, vector<1x8x256xf32>
    %5 = vector.shape_cast %4 : vector<1x8x256xf32> to vector<8x256xf32>
    %6 = vector.shape_cast %3 : vector<8x256xf32> to vector<1x8x256xf32>
    tpu.vector_store %arg4[%c0_4, %c0_5, %c0_6], %6 {strides = array<i32>} : memref<1x8x256xf32, #tpu.memory_space<vmem>>, vector<1x8x256xf32>,
    return
  }
  func.func @transform_0(%arg0: i32, %arg1: i32) -> (i32, i32) {
    %c0_i32 = arith.constant 0 : i32
    %c0_i32_0 = arith.constant 0 : i32
    %c0_i32_1 = arith.constant 0 : i32
    return %c0_i32, %c0_i32_0 : i32, i32
  }
  func.func @transform_1(%arg0: i32, %arg1: i32) -> (i32, i32, i32) {
    %c0_i32 = arith.constant 0 : i32
    %c0_i32_0 = arith.constant 0 : i32
    return %arg0, %c0_i32, %arg1 : i32, i32, i32
  }
  func.func @transform_2(%arg0: i32, %arg1: i32) -> (i32, i32, i32) {
    %c0_i32 = arith.constant 0 : i32
    %c0_i32_0 = arith.constant 0 : i32
    return %arg0, %c0_i32, %arg1 : i32, i32, i32
  }
}

</mosaic_0001>

<bundles_post_ra>
// kernel: tpu_custom_call.1
= control target key start
LH: loop header
LB: loop body
LE: loop exit
PB: predicated region body
PF: predicated region fallthrough
CT: control target
= control target key end

     0   :  { %7 = vsyncpa [#allocation3], 0  ;;  %s678_s0 = inlined_call_operand.vmem [shape: f32[8,4], index: 0, kind: input, shape index: {}]   ;;  %s679_s1 = inlined_call_operand.hbm [shape: f32[2,4,256], index: 1, kind: input, shape index: {}]   ;;  %s680_s2 = inlined_call_operand.hbm [shape: f32[2,8,256], index: 2, kind: output, shape index: {}]  }
   0x1   :  { %9 = vsyncpa [#allocation3 + $0x1], 0 }
   0x2   :  { %10 = vsyncpa [#allocation4], 0 }
   0x3   :  { %12 = vsyncpa [#allocation4 + $0x1], 0  ;;  %s554_s9 = smov 0   ;;  %s556_s10 = smov 0  }
   0x4   :  { %s558_s11 = smov 0   ;;  %s560_s12 = smov 0  }
   0x5   :  { %s562_s13 = smov 0   ;;  %s564_s14 = smov 0  }
   0x6 LB: > { %s342_s15 = sadd.s32 4294967295, %s537_s14   ;;  %s343_s16 = sadd.s32 4294967294, %s537_s14   ;;  %s537_s14 = sphi %s564_s14, %s18_s14   ;;  %s533_s13 = sphi %s562_s13, %s689_s13   ;;  %s529_s12 = sphi %s560_s12, %s688_s12   ;;  %s525_s11 = sphi %s558_s11, %s687_s11   ;;  %s521_s10 = sphi %s556_s10, %s686_s10   ;;  %s517_s9 = sphi %s554_s9, %s685_s9  }
   0x7   : > { %s30_s17 = sadd.s32 1, %s533_s13  ;;  %s60_s18 = sadd.s32 1, %s525_s11 }
   0x8   : > { %p32_p0 = scmp.ge.s32.totalorder %s30_s17, 2  ;;  %p67_p1 = scmp.ne.s32.totalorder %s525_s11, %s521_s10 }
   0x9   : > { %p68_p2 = scmp.eq.s32.totalorder %s537_s14, 0  ;;  %p73_p3 = scmp.ne.s32.totalorder %s521_s10, %s517_s9 }
   0xa   : > { %s691_s17 = smov (%p32_p0, %s30_s17), 0  ;;  %p74_p5 = scmp.eq.s32.totalorder %s342_s15, 0 }
   0xb   : > { %p595_p4 = por %p68_p2, %p67_p1  ;;  %s55_s20 = ssub.s32 %s533_s13, %s691_s17 }
   0xc   : > { %p99_p6 = scmp.eq.s32.totalorder %s342_s15, 1  ;;  %p58_p7 = scmp.eq.s32.totalorder %s55_s20, 0 }
   0xd   : > { %p601_p8 = por %p74_p5, %p73_p3  ;;  %p105_p10 = scmp.eq.s32.totalorder %s343_s16, 1 }
   0xe   : > { %p605_p9 = por %p99_p6, %p67_p1  ;;  %p345_p12 = scmp.ge.s32.totalorder %s537_s14, 2 }
   0xf   : > { %s610_s23 = scalar_select %p58_p7, %s525_s11, %s60_s18  }
  0x10   : > { %p612_p11 = por %p105_p10, %p73_p3  ;;  %p375_p13 = scmp.lt.s32.totalorder %s537_s14, 2 }
  0x11   : > { %s128_s25 = sand.u32 1, %s525_s11   ;;  %s361_s27 = sshll.u32 %s533_s13, 3 }
  0x12   : > { %s346_s26 = sshll.u32 %s128_s25, 3  ;;  %s139_s30 = scalar_lea.hbm %s679_s1, %s361_s27 }
  0x13   : > { %s132_s3 = scalar_lea.vmem [#allocation2], %s346_s26  ;;  %s141_s5 = sshll.u32 %s139_s30, 4  ;;  %s142_s5 = int_to_ptr.hbm [resolvable:$true] %s141_s5 }
  0x14   : > { %s143_s4 = sshll.u32 %s132_s3, 4  ;;  %p368_p0 = pnand %p375_p13, %p595_p4  ;;  %s144_s4 = int_to_ptr.vmem [resolvable:$true] %s143_s4 }
  0x15   : > { %p349_p1 = scmp.ge.s32.totalorder %s537_s14, 1  ;;  %p148_p2 = scmp.lt.s32.totalorder %s537_s14, 3 }
  0x16   : > { %s129_s6 = scalar_lea.sflag [#allocation3], %s128_s25 }
  0x17   : > { %370 = dma.hbm_to_vmem [thread:$0]  (!%p368_p0), %s142_s5, 128, %s144_s4, %s129_s6  }
  0x18   : > { %p149_p3 = pnand %p349_p1, %p148_p2 }
  0x19   : > { %s628_s7 = sand.u32 (!%p149_p3), 1, %s521_s10  }
  0x1a   : > { %152 = sbr.rel (%p149_p3) target bundleno = 172 (0xac), region = 28  ;;  %s350_s8 = sshll.u32 (!%p149_p3), %s628_s7, 3 }
  0x1b   : > { %s155_s15 = scalar_lea.sflag (!%p149_p3), [#allocation3], %s628_s7  ;;  %s158_s16 = scalar_lea.vmem (!%p149_p3), [#allocation2], %s350_s8 }
  0x1f   : > { %508 = dma.done.wait (%p601_p8), %s155_s15, 128  }
  0x20   : > { %510 = vsyncadd (%p601_p8), %s155_s15, 4294967168  ;;  %v183_v0 = vld [vmem:[%s158_s16] sm:$0xff]  ;;  %vm192_vm0 = vcmask 1043456   ;;  %v182_v1 = vld [vmem:[%s678_s0] sm:$0xff]  ;;  %vm188_vm1 = vcmask 31744   ;;  %s351_s20 = sshll.u32 %s628_s7, 4 }
  0x21   : > { %185 = vst [vmem:[#allocation1] ss:$2 sm:$0xff] %v183_v0  ;;  %s362_s21 = sshll.u32 %s529_s12, 4  ;;  %s179_s28 = scalar_lea.vmem [#allocation5], %s351_s20 }
  0x22   : > { %s253_s27 = scalar_lea.hbm %s680_s2, %s362_s21  ;;  %s255_s29 = sshll.u32 %s179_s28, 4  ;;  %s256_s29 = int_to_ptr.vmem [resolvable:$true] %s255_s29 }
  0x23   : > { %s257_s30 = sshll.u32 %s253_s27, 4  ;;  %s240_s3 = scalar_lea.sflag [#allocation4], %s628_s7  ;;  %s258_s30 = int_to_ptr.hbm [resolvable:$true] %s257_s30 }
  0x24   : > { %s469_s4 = sshra.s32 %s258_s30, 4  ;;  %s475_s8 = scalar_lea.hbm %s680_s2, 32  ;;  %s470_s4 = int_to_ptr.hbm [resolvable:$true] %s469_s4 }
  0x25   : > { %s471_s5 = scalar_lea.hbm %s470_s4, 16  ;;  %p476_p7 = scmp.lt.s32.totalorder %s470_s4, %s680_s2 }
  0x26   : > { %p472_p4 = scmp.ne.s32.totalorder %s470_s4, %s471_s5  ;;  %p477_p8 = scmp.lt.s32.totalorder %s475_s8, %s471_s5 }
  0x28   : > { %v186_v2 = vld.sshfl [vmem:[#allocation1] sm:$0xff pattern:$0x75316420]  ;;  %v187_v3 = vld.sshfl [vmem:[#allocation1 + $0x8] sm:$0xff pattern:$0x75316420]  ;;  %p473_p5 = pnand %p472_p4, %p605_p9  ;;  %p478_p10 = por %p477_p8, %p476_p7 }
  0x29   : > { %352 = vmatpush.msk.msra.mxu0 %vm192_vm0, %v186_v2  ;;  %354 = vmatpush.msk.msra.mxu1 %vm192_vm0, %v187_v3 }
  0x2a   : > { %353 = vmatmul.msk.f32.vlgmr.msra.gmra.mxu0 %vm188_vm1, %v182_v1  ;;  %355 = vmatmul.msk.f32.vlgmr.msra.gmra.mxu1 %vm188_vm1, %v182_v1  ;;  %p474_p6 = pneg %p473_p5 }
  0x2c   : > { %p479_p13 = pnand %p478_p10, %p474_p6 }
  0xa7   : > { %v214_v4 = vpop.f32.mrf.mxu0  ;;  %v234_v5 = vpop.f32.mrf.mxu1 }
  0xa8   : > { %237 = vst [vmem:[%s179_s28] sm:$0xff] %v214_v4 }
  0xa9   : > { %238 = vst [vmem:[%s179_s28 + $0x8] sm:$0xff] %v234_v5 }
  0xaa   : > { %482 = shalt.err (!%p479_p13)
}
  0xab   : > { %365 = dma.vmem_to_hbm [thread:$0]  (%p605_p9), %s256_s29, 256, %s258_s30, %s240_s3  }
  0xac PF: > { %s269_s7 = sand.u32 1, %s517_s9   ;;  %p372_p0 = pnand %p345_p12, %p612_p11 }
  0xad   : > { %s270_s18 = scalar_lea.sflag [#allocation4], %s269_s7 }
  0xae   : > { %p373_p1 = pneg %p372_p0 }
  0xb0   : > { %512 = dma.done.wait (%p373_p1), %s270_s18, 256  }
  0xb1   : > { %514 = vsyncadd (%p373_p1), %s270_s18, 4294967040  ;;  %s18_s14 = sadd.s32 1, %s537_s14   ;;  %s685_s9 = smov %s521_s10 }
  0xb2   : > { %p15_p2 = scmp.ge.s32.totalorder %s18_s14, 4   ;;  %s686_s10 = smov %s525_s11 }
  0xb3   : > { %s687_s11 = smov %s610_s23  ;;  %s688_s12 = smov %s533_s13 }
  0xb4   : > { %s689_s13 = smov %s691_s17  ;;  %17 = sbr.rel (!%p15_p2) target bundleno = 6 (0x6), region = 73 }
  0xb9   :  { %276 = vsyncpa [#allocation3], 1 }
  0xba   :  { %278 = vsyncpa [#allocation3 + $0x1], 1 }
  0xbb   :  { %279 = vsyncpa [#allocation4], 1 }
  0xbc   :  { %281 = vsyncpa [#allocation4 + $0x1], 1 }

</bundles_post_ra>
